<compile_context>
chip_gen: v7x
topology: tpu7x:2x2x1
jax: 0.10.0
libtpu: 0.0.40
codegen_flags: <defaults>
</compile_context>

<pallas_src>
import jax
import jax.numpy as jnp
from jax.experimental import pallas as pl
from jax.experimental.pallas import tpu as pltpu


def _round_up(n, m):
    return ((n + m - 1) // m) * m


def mlp_kernel(x_ref, w1_ref, b1_ref, w2_ref, b2_ref, w3_ref, b3_ref, o_ref):
    """out = sigmoid(relu(relu(x@W1+b1)@W2+b2)@W3+b3) for one batch tile.

    Matmuls: bf16 inputs, f32 accumulation on the MXU. Elementwise epilogue in
    f32. nn.Dropout is identity at inference.
    """
    # x arrives f32 straight from HBM; cast to bf16 on the VPU just before MXU.
    x = x_ref[...].astype(jnp.bfloat16)                          # (TB, in_p)

    # fc1 + ReLU
    h1 = jnp.dot(x, w1_ref[...], preferred_element_type=jnp.float32)
    h1 = jnp.maximum(h1 + b1_ref[...], 0.0)                      # (TB, h1_p) f32
    # TODO(synk): training-mode dropout (random mask + 1/(1-p) scaling) not
    # implemented; eval-mode nn.Dropout is an identity.

    # fc2 + ReLU
    h2 = jnp.dot(h1.astype(jnp.bfloat16), w2_ref[...],
                 preferred_element_type=jnp.float32)
    h2 = jnp.maximum(h2 + b2_ref[...], 0.0)                      # (TB, h2_p) f32

    # fc3 + Sigmoid (exact: exp on EUP, exact f32 divide), store as bf16.
    z = jnp.dot(h2.astype(jnp.bfloat16), w3_ref[...],
                preferred_element_type=jnp.float32)
    z = z + b3_ref[...]                                          # (TB, out_p) f32
    o_ref[...] = (1.0 / (1.0 + jnp.exp(-z))).astype(o_ref.dtype)


def prepare_params(params):
    """Pad feature dims to multiples of 128 and cast weights to bf16 ONCE.

    params: W1/W2/W3 stored (in, out) so the kernel computes x @ W
    (== PyTorch x @ W.T with (out, in) weights); b1/b2/b3 shaped (out,) or
    (1, out). Returns padded device arrays to be reused across forward calls.
    """
    in_dim, hid1 = params["W1"].shape
    hid2 = params["W2"].shape[1]
    out_dim = params["W3"].shape[1]
    in_p, h1_p = _round_up(in_dim, 128), _round_up(hid1, 128)
    h2_p, out_p = _round_up(hid2, 128), _round_up(out_dim, 128)

    def pad2(a, rows, cols, dtype):
        a = jnp.asarray(a, dtype).reshape(-1, a.shape[-1]) if a.ndim == 1 else jnp.asarray(a, dtype)
        pr, pc = rows - a.shape[0], cols - a.shape[1]
        if pr or pc:
            a = jnp.pad(a, ((0, pr), (0, pc)))
        return a

    return {
        "W1": pad2(params["W1"], in_p, h1_p, jnp.bfloat16),
        "b1": pad2(params["b1"].reshape(1, -1), 1, h1_p, jnp.float32),
        "W2": pad2(params["W2"], h1_p, h2_p, jnp.bfloat16),
        "b2": pad2(params["b2"].reshape(1, -1), 1, h2_p, jnp.float32),
        "W3": pad2(params["W3"], h2_p, out_p, jnp.bfloat16),
        "b3": pad2(params["b3"].reshape(1, -1), 1, out_p, jnp.float32),
        "dims": (in_dim, out_dim),
    }


def mlp_forward(x_nchw, prepared, *, batch_tile=512):
    """x_nchw: (B, C, H, W) float32; prepared: output of prepare_params."""
    in_dim, out_dim = prepared["dims"]
    in_p, h1_p = prepared["W1"].shape
    h2_p, out_p = prepared["W3"].shape

    B = x_nchw.shape[0]
    x2d = x_nchw.reshape(B, -1).astype(jnp.float32)              # torch.flatten(x, 1)
    assert x2d.shape[1] == in_dim

    # Batch tile: multiple of 16 (bf16 output sublane packing), capped at
    # batch_tile, and sized so the grid has >= 2 steps when B allows it
    # (keeps both v7x TensorCores busy via the "parallel" axis).
    TB = min(batch_tile, max(16, _round_up((B + 1) // 2, 16)))
    B_p = _round_up(B, TB)

    # Pad only when needed; for aligned shapes x goes in with zero extra copies.
    xp = x2d
    if B_p != B or in_p != in_dim:
        xp = jnp.pad(xp, ((0, B_p - B), (0, in_p - in_dim)))

    grid = (B_p // TB,)

    def const(shape):
        # Same block every grid step -> weights/biases stay VMEM-resident.
        return pl.BlockSpec(shape, lambda i: (0, 0))

    flops = 2 * B_p * (in_p * h1_p + h1_p * h2_p + h2_p * out_p)
    bytes_accessed = (
        B_p * in_p * 4                                            # x (f32 in)
        + (in_p * h1_p + h1_p * h2_p + h2_p * out_p) * 2          # weights (bf16)
        + (h1_p + h2_p + out_p) * 4                               # biases (f32)
        + B_p * out_p * 2                                         # out (bf16)
    )

    out_padded = pl.pallas_call(
        mlp_kernel,
        out_shape=jax.ShapeDtypeStruct((B_p, out_p), jnp.bfloat16),
        grid=grid,
        in_specs=[
            pl.BlockSpec((TB, in_p), lambda i: (i, 0)),           # x tile over batch
            const((in_p, h1_p)), const((1, h1_p)),
            const((h1_p, h2_p)), const((1, h2_p)),
            const((h2_p, out_p)), const((1, out_p)),
        ],
        out_specs=pl.BlockSpec((TB, out_p), lambda i: (i, 0)),
        compiler_params=pltpu.CompilerParams(
            dimension_semantics=("parallel",)),
        cost_estimate=pl.CostEstimate(flops=flops,
                                      transcendentals=B_p * out_p,
                                      bytes_accessed=bytes_accessed),
    )(xp, prepared["W1"], prepared["b1"], prepared["W2"], prepared["b2"],
      prepared["W3"], prepared["b3"])

    # Drop padded batch rows and padded (sigmoid(0)=0.5) output columns.
    return out_padded[:B, :out_dim].astype(jnp.float32)


def init_params(key, in_dim, hidden1, hidden2, out_dim):
    """Deterministic PyTorch-style (Kaiming-uniform-ish) Linear init."""
    def linear(k, fan_in, fan_out):
        kw, kb = jax.random.split(k)
        bound = 1.0 / jnp.sqrt(jnp.float32(fan_in))
        W = jax.random.uniform(kw, (fan_in, fan_out), jnp.float32, -bound, bound)
        b = jax.random.uniform(kb, (1, fan_out), jnp.float32, -bound, bound)
        return W, b

    k1, k2, k3 = jax.random.split(key, 3)
    W1, b1 = linear(k1, in_dim, hidden1)
    W2, b2 = linear(k2, hidden1, hidden2)
    W3, b3 = linear(k3, hidden2, out_dim)
    return {"W1": W1, "b1": b1, "W2": W2, "b2": b2, "W3": W3, "b3": b3}


if __name__ == "__main__":
    # Small CIFAR-like shapes: batch=2, channels=4, spatial=16x16
    B, C, H, W = 2, 4, 16, 16
    in_dim = C * H * W          # 1024 (already lane-aligned)
    hidden1, hidden2 = 32, 32
    out_dim = 10

    key = jax.random.PRNGKey(0)
    kx, kp = jax.random.split(key)
    x = jax.random.normal(kx, (B, C, H, W), jnp.float32)
    params = init_params(kp, in_dim, hidden1, hidden2, out_dim)
    prepared = prepare_params(params)   # pad/cast weights ONCE, reuse per call

    out = mlp_forward(x, prepared)
    out = jax.block_until_ready(out)
    assert out.shape == (B, out_dim)

    # Pure-JAX reference (bf16 matmul inputs, f32 accumulation, f32 epilogue;
    # eval-mode dropout = identity). Kernel stores bf16, so allow ~1 bf16 ulp.
    x2d = x.reshape(B, -1)

    def bdot(a, w):
        return jnp.dot(a.astype(jnp.bfloat16), w.astype(jnp.bfloat16),
                       preferred_element_type=jnp.float32)

    h = jnp.maximum(bdot(x2d, params["W1"]) + params["b1"], 0.0)
    h = jnp.maximum(bdot(h, params["W2"]) + params["b2"], 0.0)
    ref = jax.nn.sigmoid(bdot(h, params["W3"]) + params["b3"])

    err = jnp.max(jnp.abs(out - ref))
    assert jnp.allclose(out, ref, atol=4e-3, rtol=2e-3), f"max err {err}"

    print("KERNEL_OK")
</pallas_src>

<mosaic_0001>
module attributes {stable_mosaic.version = 11 : i64} {
  func.func @mlp_kernel(%arg0: i32, %arg1: memref<16x1024xf32, #tpu.memory_space<vmem>>, %arg2: memref<1024x128xbf16, #tpu.memory_space<vmem>>, %arg3: memref<1x128xf32, #tpu.memory_space<vmem>>, %arg4: memref<128x128xbf16, #tpu.memory_space<vmem>>, %arg5: memref<1x128xf32, #tpu.memory_space<vmem>>, %arg6: memref<128x128xbf16, #tpu.memory_space<vmem>>, %arg7: memref<1x128xf32, #tpu.memory_space<vmem>>, %arg8: memref<16x128xbf16, #tpu.memory_space<vmem>>) attributes {dimension_semantics = [#tpu.dimension_semantics<parallel>], iteration_bounds = array<i64: 1>, scalar_prefetch = 0 : i64, scratch_operands = 0 : i64, tpu.core_type = #tpu.core_type<tc>, window_params = [{transform_indices = @transform_0, window_bounds = array<i64: 16, 1024>}, {pipeline_mode = #tpu.pipeline_mode<synchronous>, transform_indices = @transform_1, window_bounds = array<i64: 1024, 128>}, {pipeline_mode = #tpu.pipeline_mode<synchronous>, transform_indices = @transform_2, window_bounds = array<i64: 1, 128>}, {pipeline_mode = #tpu.pipeline_mode<synchronous>, transform_indices = @transform_3, window_bounds = array<i64: 128, 128>}, {pipeline_mode = #tpu.pipeline_mode<synchronous>, transform_indices = @transform_4, window_bounds = array<i64: 1, 128>}, {pipeline_mode = #tpu.pipeline_mode<synchronous>, transform_indices = @transform_5, window_bounds = array<i64: 128, 128>}, {pipeline_mode = #tpu.pipeline_mode<synchronous>, transform_indices = @transform_6, window_bounds = array<i64: 1, 128>}, {transform_indices = @transform_7, window_bounds = array<i64: 16, 128>}]} {
    %c0 = arith.constant 0 : index
    %c0_0 = arith.constant 0 : index
    %0 = vector.load %arg1[%c0, %c0_0] : memref<16x1024xf32, #tpu.memory_space<vmem>>, vector<16x1024xf32>
    %1 = arith.truncf %0 : vector<16x1024xf32> to vector<16x1024xbf16>
    %c0_1 = arith.constant 0 : index
    %c0_2 = arith.constant 0 : index
    %2 = vector.load %arg2[%c0_1, %c0_2] : memref<1024x128xbf16, #tpu.memory_space<vmem>>, vector<1024x128xbf16>
    %cst = arith.constant dense<0.000000e+00> : vector<16x128xf32>
    %3 = tpu.matmul %1, %2, %cst {dimension_numbers = #tpu.dot_dimension_numbers<[1], [0], [0], [1], [0, 0, 1, 1], [], []>} : vector<16x1024xbf16>, vector<1024x128xbf16>, vector<16x128xf32> -> vector<16x128xf32>
    %c0_3 = arith.constant 0 : index
    %c0_4 = arith.constant 0 : index
    %4 = vector.load %arg3[%c0_3, %c0_4] : memref<1x128xf32, #tpu.memory_space<vmem>>, vector<1x128xf32>
    %5 = vector.broadcast %4 : vector<1x128xf32> to vector<16x128xf32>
    %6 = arith.addf %3, %5 : vector<16x128xf32>
    %cst_5 = arith.constant 0.000000e+00 : f32
    %7 = vector.broadcast %cst_5 : f32 to vector<16x128xf32>
    %8 = arith.maximumf %6, %7 : vector<16x128xf32>
    %9 = arith.truncf %8 : vector<16x128xf32> to vector<16x128xbf16>
    %c0_6 = arith.constant 0 : index
    %c0_7 = arith.constant 0 : index
    %10 = vector.load %arg4[%c0_6, %c0_7] : memref<128x128xbf16, #tpu.memory_space<vmem>>, vector<128x128xbf16>
    %cst_8 = arith.constant dense<0.000000e+00> : vector<16x128xf32>
    %11 = tpu.matmul %9, %10, %cst_8 {dimension_numbers = #tpu.dot_dimension_numbers<[1], [0], [0], [1], [0, 0, 1, 1], [], []>} : vector<16x128xbf16>, vector<128x128xbf16>, vector<16x128xf32> -> vector<16x128xf32>
    %c0_9 = arith.constant 0 : index
    %c0_10 = arith.constant 0 : index
    %12 = vector.load %arg5[%c0_9, %c0_10] : memref<1x128xf32, #tpu.memory_space<vmem>>, vector<1x128xf32>
    %13 = vector.broadcast %12 : vector<1x128xf32> to vector<16x128xf32>
    %14 = arith.addf %11, %13 : vector<16x128xf32>
    %cst_11 = arith.constant 0.000000e+00 : f32
    %15 = vector.broadcast %cst_11 : f32 to vector<16x128xf32>
    %16 = arith.maximumf %14, %15 : vector<16x128xf32>
    %17 = arith.truncf %16 : vector<16x128xf32> to vector<16x128xbf16>
    %c0_12 = arith.constant 0 : index
    %c0_13 = arith.constant 0 : index
    %18 = vector.load %arg6[%c0_12, %c0_13] : memref<128x128xbf16, #tpu.memory_space<vmem>>, vector<128x128xbf16>
    %cst_14 = arith.constant dense<0.000000e+00> : vector<16x128xf32>
    %19 = tpu.matmul %17, %18, %cst_14 {dimension_numbers = #tpu.dot_dimension_numbers<[1], [0], [0], [1], [0, 0, 1, 1], [], []>} : vector<16x128xbf16>, vector<128x128xbf16>, vector<16x128xf32> -> vector<16x128xf32>
    %c0_15 = arith.constant 0 : index
    %c0_16 = arith.constant 0 : index
    %20 = vector.load %arg7[%c0_15, %c0_16] : memref<1x128xf32, #tpu.memory_space<vmem>>, vector<1x128xf32>
    %21 = vector.broadcast %20 : vector<1x128xf32> to vector<16x128xf32>
    %22 = arith.addf %19, %21 : vector<16x128xf32>
    %cst_17 = arith.constant 0.000000e+00 : f32
    %23 = vector.broadcast %cst_17 : f32 to vector<16x128xf32>
    %24 = arith.subf %23, %22 : vector<16x128xf32>
    %25 = math.exp %24 : vector<16x128xf32>
    %cst_18 = arith.constant 1.000000e+00 : f32
    %26 = vector.broadcast %cst_18 : f32 to vector<16x128xf32>
    %27 = arith.addf %26, %25 : vector<16x128xf32>
    %cst_19 = arith.constant 1.000000e+00 : f32
    %28 = vector.broadcast %cst_19 : f32 to vector<16x128xf32>
    %29 = arith.divf %28, %27 : vector<16x128xf32>
    %30 = arith.truncf %29 : vector<16x128xf32> to vector<16x128xbf16>
    %c0_20 = arith.constant 0 : index
    %c0_21 = arith.constant 0 : index
    %31 = vector.load %arg8[%c0_20, %c0_21] : memref<16x128xbf16, #tpu.memory_space<vmem>>, vector<16x128xbf16>
    tpu.vector_store %arg8[%c0_20, %c0_21], %30 {strides = array<i32>} : memref<16x128xbf16, #tpu.memory_space<vmem>>, vector<16x128xbf16>,
    return
  }
  func.func @transform_0(%arg0: i32) -> (i32, i32) {
    %c0_i32 = arith.constant 0 : i32
    %c0_i32_0 = arith.constant 0 : i32
    return %arg0, %c0_i32 : i32, i32
  }
  func.func @transform_1(%arg0: i32) -> (i32, i32) {
    %c0_i32 = arith.constant 0 : i32
    %c0_i32_0 = arith.constant 0 : i32
    %c0_i32_1 = arith.constant 0 : i32
    return %c0_i32, %c0_i32_0 : i32, i32
  }
  func.func @transform_2(%arg0: i32) -> (i32, i32) {
    %c0_i32 = arith.constant 0 : i32
    %c0_i32_0 = arith.constant 0 : i32
    %c0_i32_1 = arith.constant 0 : i32
    return %c0_i32, %c0_i32_0 : i32, i32
  }
  func.func @transform_3(%arg0: i32) -> (i32, i32) {
    %c0_i32 = arith.constant 0 : i32
    %c0_i32_0 = arith.constant 0 : i32
    %c0_i32_1 = arith.constant 0 : i32
    return %c0_i32, %c0_i32_0 : i32, i32
  }
  func.func @transform_4(%arg0: i32) -> (i32, i32) {
    %c0_i32 = arith.constant 0 : i32
    %c0_i32_0 = arith.constant 0 : i32
    %c0_i32_1 = arith.constant 0 : i32
    return %c0_i32, %c0_i32_0 : i32, i32
  }
  func.func @transform_5(%arg0: i32) -> (i32, i32) {
    %c0_i32 = arith.constant 0 : i32
    %c0_i32_0 = arith.constant 0 : i32
    %c0_i32_1 = arith.constant 0 : i32
    return %c0_i32, %c0_i32_0 : i32, i32
  }
  func.func @transform_6(%arg0: i32) -> (i32, i32) {
    %c0_i32 = arith.constant 0 : i32
    %c0_i32_0 = arith.constant 0 : i32
    %c0_i32_1 = arith.constant 0 : i32
    return %c0_i32, %c0_i32_0 : i32, i32
  }
  func.func @transform_7(%arg0: i32) -> (i32, i32) {
    %c0_i32 = arith.constant 0 : i32
    %c0_i32_0 = arith.constant 0 : i32
    return %arg0, %c0_i32 : i32, i32
  }
}

</mosaic_0001>

<bundles_post_ra>
// kernel: tpu_custom_call.1
= control target key start
LH: loop header
LB: loop body
LE: loop exit
PB: predicated region body
PF: predicated region fallthrough
CT: control target
= control target key end

     0   :  { %12 = vsyncpa [#allocation3], 0  ;;  %s1665_s0 = inlined_call_operand.hbm [shape: f32[16,1024], index: 0, kind: input, shape index: {}]   ;;  %s1666_s1 = inlined_call_operand.hbm [shape: bf16[1024,128], index: 1, kind: input, shape index: {}]   ;;  %s1667_s2 = inlined_call_operand.vmem [shape: f32[1,128], index: 2, kind: input, shape index: {}]   ;;  %s1668_s3 = inlined_call_operand.hbm [shape: bf16[128,128], index: 3, kind: input, shape index: {}]   ;;  %s1669_s4 = inlined_call_operand.vmem [shape: f32[1,128], index: 4, kind: input, shape index: {}]   ;;  %s1670_s5 = inlined_call_operand.hbm [shape: bf16[128,128], index: 5, kind: input, shape index: {}]   ;;  %s1671_s6 = inlined_call_operand.vmem [shape: f32[1,128], index: 6, kind: input, shape index: {}]   ;;  %s1672_s7 = inlined_call_operand.hbm [shape: bf16[16,128], index: 7, kind: output, shape index: {}]  }
   0x1   :  { %13 = vsyncpa [#allocation6], 0 }
   0x2   :  { %14 = vsyncpa [#allocation9], 0 }
   0x3   :  { %15 = vsyncpa [#allocation4], 0  ;;  %s1515_s24 = smov [#allocation5]   ;;  %s1397_s28 = scalar_lea.hbm %s1666_s1, 8192 }
   0x4   :  { %s33_s25 = sshll.u32 %s1515_s24, 4  ;;  %p1398_p0 = scmp.ne.s32.totalorder %s1666_s1, %s1397_s28  ;;  %s34_s25 = int_to_ptr.vmem [resolvable:$true] %s33_s25 }
   0x5   :  { %p1401_p1 = scmp.lt.u32.totalorder %s1397_s28, %s1666_s1 }
   0x7   :  { %p1403_p2 = pnand %p1401_p1, %p1398_p0 }
   0x9   :  { %1406 = shalt.err (!%p1403_p2)
}
   0xa   :  { %s1407_s10 = scalar_lea.vmem %s34_s25, 8192  ;;  %p1412_p4 = scmp.lt.s32.totalorder %s34_s25, %s34_s25 }
   0xb   :  { %p1408_p3 = scmp.ne.s32.totalorder %s34_s25, %s1407_s10  ;;  %p1413_p5 = scmp.lt.s32.totalorder %s1407_s10, %s1407_s10 }
   0xd   :  { %p1414_p6 = por %p1413_p5, %p1412_p4 }
   0xf   :  { %p1415_p7 = pnand %p1414_p6, %p1408_p3 }
  0x11   :  { %1418 = shalt.err (!%p1415_p7)
}
  0x12   :  { %s1516_s11 = smov 64   ;;  %s1517_s12 = smov 4  }
  0x13   :  { %39 = dma.hbm_to_vmem [thread:$0]  %s1666_s1, 8192, %s34_s25, [#allocation6], %s1516_s11, %s1516_s11, %s1517_s12  }
  0x14   :  { %s1518_s15 = smov [#allocation2]   ;;  %s1419_s19 = scalar_lea.hbm %s1665_s0, 2048 }
  0x15   :  { %s21_s16 = sshll.u32 %s1518_s15, 4  ;;  %p1420_p8 = scmp.ne.s32.totalorder %s1665_s0, %s1419_s19  ;;  %s22_s16 = int_to_ptr.vmem [resolvable:$true] %s21_s16 }
  0x16   :  { %p1423_p9 = scmp.lt.u32.totalorder %s1419_s19, %s1665_s0 }
  0x18   :  { %p1425_p10 = pnand %p1423_p9, %p1420_p8 }
  0x1a   :  { %1428 = shalt.err (!%p1425_p10)
}
  0x1b   :  { %s1429_s24 = scalar_lea.vmem %s22_s16, 2048  ;;  %p1434_p12 = scmp.lt.s32.totalorder %s22_s16, %s22_s16 }
  0x1c   :  { %p1430_p11 = scmp.ne.s32.totalorder %s22_s16, %s1429_s24  ;;  %p1435_p13 = scmp.lt.s32.totalorder %s1429_s24, %s1429_s24 }
  0x1e   :  { %p1436_p0 = por %p1435_p13, %p1434_p12 }
  0x20   :  { %p1437_p1 = pnand %p1436_p0, %p1430_p11 }
  0x22   :  { %1440 = shalt.err (!%p1437_p1)
}
  0x23   :  { %s1519_s1 = smov 1024   ;;  %s1520_s27 = smov [#allocation7]  }
  0x24   :  { %27 = dma.hbm_to_vmem [thread:$0]  %s1665_s0, 2048, %s22_s16, [#allocation3], %s1519_s1, %s1519_s1, %s1516_s11  }
  0x25   :  { %s47_s28 = sshll.u32 %s1520_s27, 4  ;;  %s1521_s29 = smov [#allocation8]   ;;  %s48_s28 = int_to_ptr.vmem [resolvable:$true] %s47_s28 }
  0x26   :  { %s61_s30 = sshll.u32 %s1521_s29, 4  ;;  %s1441_s10 = scalar_lea.hbm %s1668_s3, 1024  ;;  %s62_s30 = int_to_ptr.vmem [resolvable:$true] %s61_s30 }
  0x27   :  { %p1442_p2 = scmp.ne.s32.totalorder %s1668_s3, %s1441_s10  ;;  %p1445_p3 = scmp.lt.u32.totalorder %s1441_s10, %s1668_s3 }
  0x29   :  { %p1447_p4 = pnand %p1445_p3, %p1442_p2 }
  0x2b   :  { %1450 = shalt.err (!%p1447_p4)
}
  0x2c   :  { %s1451_s0 = scalar_lea.vmem %s48_s28, 1024  ;;  %p1456_p6 = scmp.lt.s32.totalorder %s48_s28, %s48_s28 }
  0x2d   :  { %p1452_p5 = scmp.ne.s32.totalorder %s48_s28, %s1451_s0  ;;  %p1457_p7 = scmp.lt.s32.totalorder %s1451_s0, %s1451_s0 }
  0x2f   :  { %p1458_p8 = por %p1457_p7, %p1456_p6 }
  0x31   :  { %p1459_p9 = pnand %p1458_p8, %p1452_p5 }
  0x33   :  { %1462 = shalt.err (!%p1459_p9)
}
  0x34   :  { %53 = dma.hbm_to_vmem [thread:$0]  %s1668_s3, 1024, %s48_s28, [#allocation6], %s1516_s11, %s1516_s11, %s1517_s12  }
  0x35   :  { %s1463_s21 = scalar_lea.hbm %s1670_s5, 1024 }
  0x36   :  { %p1464_p10 = scmp.ne.s32.totalorder %s1670_s5, %s1463_s21  ;;  %p1467_p11 = scmp.lt.u32.totalorder %s1463_s21, %s1670_s5 }
  0x38   :  { %p1469_p12 = pnand %p1467_p11, %p1464_p10 }
  0x3a   :  { %1472 = shalt.err (!%p1469_p12)
}
  0x3b   :  { %s1473_s25 = scalar_lea.vmem %s62_s30, 1024  ;;  %p1478_p0 = scmp.lt.s32.totalorder %s62_s30, %s62_s30 }
  0x3c   :  { %p1474_p13 = scmp.ne.s32.totalorder %s62_s30, %s1473_s25  ;;  %p1479_p1 = scmp.lt.s32.totalorder %s1473_s25, %s1473_s25 }
  0x3e   :  { %p1480_p2 = por %p1479_p1, %p1478_p0 }
  0x40   :  { %p1481_p3 = pnand %p1480_p2, %p1474_p13 }
  0x42   :  { %1484 = shalt.err (!%p1481_p3)
}
  0x43   :  { %67 = dma.hbm_to_vmem [thread:$0]  %s1670_s5, 1024, %s62_s30, [#allocation9], %s1516_s11, %s1516_s11, %s1517_s12  }
  0x44   :  { %1507 = dma.done.wait [#allocation3], 2048  }
  0x45   :  { %1508 = vsyncadd [#allocation3], 4294965248 }
  0x46   :  { %1509 = dma.done.wait [#allocation6], 9216  }
  0x47   :  { %1510 = vsyncadd [#allocation6], 4294958080 }
  0x48   :  { %1511 = dma.done.wait [#allocation9], 1024  }
  0x49   :  { %1512 = vsyncadd [#allocation9], 4294966272  ;;  %v1309_v0 = vld [vmem:[#allocation5 + $0x40] sm:$0xff]   ;;  %v1313_v4 = vld [vmem:[#allocation5 + $0x48] sm:$0xff]   ;;  %vm1523_vm0 = vmmov 0  }
  0x4a   :  { %v1310_v1 = vld [vmem:[#allocation5 + $0xc0] sm:$0xff]   ;;  %1153 = vmatprep.subr.bf16.mxu0 %v1309_v0  ;;  %v1314_v5 = vld [vmem:[#allocation5 + $0xc8] sm:$0xff]   ;;  %v1317_v8 = vld [vmem:[#allocation5 + $0x50] sm:$0xff]  }
  0x4b   :  { %v1311_v2 = vld [vmem:[#allocation5] sm:$0xff]   ;;  %1175 = vmatprep.subr.bf16.mxu1 %v1310_v1  ;;  %v1315_v6 = vld [vmem:[#allocation5 + $0x8] sm:$0xff]   ;;  %v1318_v9 = vld [vmem:[#allocation5 + $0xd0] sm:$0xff]  }
  0x4c   :  { %v1312_v3 = vld [vmem:[#allocation5 + $0x80] sm:$0xff]   ;;  %1154 = vmatpush3.bf16.msra.mxu0 %v1311_v2  ;;  %v1316_v7 = vld [vmem:[#allocation5 + $0x88] sm:$0xff]   ;;  %v1319_v10 = vld [vmem:[#allocation5 + $0x10] sm:$0xff]  }
  0x4d   :  { %1176 = vmatpush3.bf16.msra.mxu1 %v1312_v3  ;;  %1155 = vmatprep.subr.bf16.mxu0 %v1313_v4  ;;  %v1320_v11 = vld [vmem:[#allocation5 + $0x90] sm:$0xff]   ;;  %v1321_v12 = vld [vmem:[#allocation5 + $0x58] sm:$0xff]   ;;  %v1325_v16 = vld [vmem:[#allocation5 + $0x60] sm:$0xff]  }
  0x4e   :  { %1177 = vmatprep.subr.bf16.mxu1 %v1314_v5  ;;  %v1322_v13 = vld [vmem:[#allocation5 + $0xd8] sm:$0xff]   ;;  %v1326_v17 = vld [vmem:[#allocation5 + $0xe0] sm:$0xff]   ;;  %v1329_v20 = vld [vmem:[#allocation5 + $0x68] sm:$0xff]  }
  0x4f   :  { %v1323_v14 = vld [vmem:[#allocation5 + $0x18] sm:$0xff]   ;;  %v1327_v18 = vld [vmem:[#allocation5 + $0x20] sm:$0xff]   ;;  %v1330_v21 = vld [vmem:[#allocation5 + $0xe8] sm:$0xff]  }
  0x50   :  { %1156 = vmatpush3.bf16.msra.mxu0 %v1315_v6  ;;  %v1324_v15 = vld [vmem:[#allocation5 + $0x98] sm:$0xff]   ;;  %v1328_v19 = vld [vmem:[#allocation5 + $0xa0] sm:$0xff]   ;;  %v1331_v22 = vld [vmem:[#allocation5 + $0x28] sm:$0xff]  }
  0x51   :  { %1178 = vmatpush3.bf16.msra.mxu1 %v1316_v7  ;;  %1157 = vmatprep.subr.bf16.mxu0 %v1317_v8  ;;  %v1332_v23 = vld [vmem:[#allocation5 + $0xa8] sm:$0xff]   ;;  %v1333_v24 = vld [vmem:[#allocation5 + $0x70] sm:$0xff]   ;;  %v1337_v28 = vld [vmem:[#allocation5 + $0x78] sm:$0xff]  }
  0x52   :  { %1179 = vmatprep.subr.bf16.mxu1 %v1318_v9  ;;  %v1334_v25 = vld [vmem:[#allocation5 + $0xf0] sm:$0xff]   ;;  %v1338_v29 = vld [vmem:[#allocation5 + $0xf8] sm:$0xff]   ;;  %v84_v32 = vld [vmem:[#allocation2 + $0x8] sm:$0xff] }
  0x53   :  { %v1335_v26 = vld [vmem:[#allocation5 + $0x30] sm:$0xff]   ;;  %v1339_v30 = vld [vmem:[#allocation5 + $0x38] sm:$0xff]   ;;  %v92_v33 = vld [vmem:[#allocation2 + $0x48] sm:$0xff] }
  0x54   :  { %1158 = vmatpush3.bf16.msra.mxu0 %v1319_v10  ;;  %v1336_v27 = vld [vmem:[#allocation5 + $0xb0] sm:$0xff]   ;;  %v1340_v31 = vld [vmem:[#allocation5 + $0xb8] sm:$0xff]   ;;  %v100_v35 = vpack.c.bf16 %v92_v33, %v84_v32  ;;  %v83_v37 = vld [vmem:[#allocation2] sm:$0xff] }
  0x55   :  { %1180 = vmatpush3.bf16.msra.mxu1 %v1320_v11  ;;  %1159 = vmatprep.subr.bf16.mxu0 %v1321_v12  ;;  %v86_v34 = vld [vmem:[#allocation2 + $0x18] sm:$0xff]  ;;  %v91_v38 = vld [vmem:[#allocation2 + $0x40] sm:$0xff]  ;;  %v85_v41 = vld [vmem:[#allocation2 + $0x10] sm:$0xff] }
  0x56   :  { %1181 = vmatprep.subr.bf16.mxu1 %v1322_v13  ;;  %v94_v36 = vld [vmem:[#allocation2 + $0x58] sm:$0xff]  ;;  %v99_v40 = vpack.c.bf16 %v91_v38, %v83_v37  ;;  %v93_v42 = vld [vmem:[#allocation2 + $0x50] sm:$0xff]  ;;  %658 = vmatprep.mubr.bf16.mxu0 %v100_v35  ;;  %v1341_v44 = vld [vmem:[#allocation5 + $0x140] sm:$0xff]  }
  0x57   :  { %v102_v39 = vpack.c.bf16 %v94_v36, %v86_v34  ;;  %v101_v43 = vpack.c.bf16 %v93_v42, %v85_v41  ;;  %v1342_v45 = vld [vmem:[#allocation5 + $0x1c0] sm:$0xff]   ;;  %v1345_v48 = vld [vmem:[#allocation5 + $0x148] sm:$0xff]   ;;  %v1349_v52 = vld [vmem:[#allocation5 + $0x150] sm:$0xff]  }
  0x58   :  { %1160 = vmatpush3.bf16.msra.mxu0 %v1323_v14  ;;  %v1343_v46 = vld [vmem:[#allocation5 + $0x100] sm:$0xff]   ;;  %v1346_v49 = vld [vmem:[#allocation5 + $0x1c8] sm:$0xff]   ;;  %v1350_v53 = vld [vmem:[#allocation5 + $0x1d0] sm:$0xff]  }
  0x59   :  { %1182 = vmatpush3.bf16.msra.mxu1 %v1324_v15  ;;  %1161 = vmatprep.subr.bf16.mxu0 %v1325_v16  ;;  %v1344_v47 = vld [vmem:[#allocation5 + $0x180] sm:$0xff]   ;;  %v1347_v50 = vld [vmem:[#allocation5 + $0x108] sm:$0xff]   ;;  %v1351_v54 = vld [vmem:[#allocation5 + $0x110] sm:$0xff]  }
  0x5a   :  { %1183 = vmatprep.subr.bf16.mxu1 %v1326_v17  ;;  %699 = vmatprep.mubr.bf16.mxu1 %v102_v39  ;;  %v1348_v51 = vld [vmem:[#allocation5 + $0x188] sm:$0xff]   ;;  %v1352_v55 = vld [vmem:[#allocation5 + $0x190] sm:$0xff]   ;;  %v1353_v56 = vld [vmem:[#allocation5 + $0x158] sm:$0xff]  }
  0x5b   :  { %v1354_v57 = vld [vmem:[#allocation5 + $0x1d8] sm:$0xff]   ;;  %v1357_v60 = vld [vmem:[#allocation5 + $0x160] sm:$0xff]   ;;  %v1361_v0 = vld [vmem:[#allocation5 + $0x168] sm:$0xff]  }
  0x5c   :  { %1162 = vmatpush3.bf16.msra.mxu0 %v1327_v18  ;;  %v1355_v58 = vld [vmem:[#allocation5 + $0x118] sm:$0xff]   ;;  %v1358_v61 = vld [vmem:[#allocation5 + $0x1e0] sm:$0xff]   ;;  %v1362_v1 = vld [vmem:[#allocation5 + $0x1e8] sm:$0xff]  }
  0x5d   :  { %1184 = vmatpush3.bf16.msra.mxu1 %v1328_v19  ;;  %1163 = vmatprep.subr.bf16.mxu0 %v1329_v20  ;;  %v1356_v59 = vld [vmem:[#allocation5 + $0x198] sm:$0xff]   ;;  %v1359_v62 = vld [vmem:[#allocation5 + $0x120] sm:$0xff]   ;;  %v1363_v2 = vld [vmem:[#allocation5 + $0x128] sm:$0xff]  }
  0x5e   :  { %1185 = vmatprep.subr.bf16.mxu1 %v1330_v21  ;;  %v1360_v63 = vld [vmem:[#allocation5 + $0x1a0] sm:$0xff]   ;;  %v1364_v3 = vld [vmem:[#allocation5 + $0x1a8] sm:$0xff]   ;;  %v1365_v4 = vld [vmem:[#allocation5 + $0x170] sm:$0xff]  }
  0x5f   :  { %v1366_v5 = vld [vmem:[#allocation5 + $0x1f0] sm:$0xff]   ;;  %v1369_v8 = vld [vmem:[#allocation5 + $0x178] sm:$0xff]   ;;  %v88_v12 = vld [vmem:[#allocation2 + $0x28] sm:$0xff] }
  0x60   :  { %1164 = vmatpush3.bf16.msra.mxu0 %v1331_v22  ;;  %v1367_v6 = vld [vmem:[#allocation5 + $0x130] sm:$0xff]   ;;  %v1370_v9 = vld [vmem:[#allocation5 + $0x1f8] sm:$0xff]   ;;  %v96_v13 = vld [vmem:[#allocation2 + $0x68] sm:$0xff] }
  0x61   :  { %1186 = vmatpush3.bf16.msra.mxu1 %v1332_v23  ;;  %1165 = vmatprep.subr.bf16.mxu0 %v1333_v24  ;;  %v1368_v7 = vld [vmem:[#allocation5 + $0x1b0] sm:$0xff]   ;;  %v1371_v10 = vld [vmem:[#allocation5 + $0x138] sm:$0xff]   ;;  %v104_v16 = vpack.c.bf16 %v96_v13, %v88_v12  ;;  %v87_v18 = vld [vmem:[#allocation2 + $0x20] sm:$0xff] }
  0x62   :  { %1187 = vmatprep.subr.bf16.mxu1 %v1334_v25  ;;  %v1372_v11 = vld [vmem:[#allocation5 + $0x1b8] sm:$0xff]   ;;  %v95_v19 = vld [vmem:[#allocation2 + $0x60] sm:$0xff]  ;;  %v89_v20 = vld [vmem:[#allocation2 + $0x30] sm:$0xff]  ;;  %v1522_v25 = vmov 0.0  }
  0x63   :  { %v90_v14 = vld [vmem:[#allocation2 + $0x38] sm:$0xff]  ;;  %v103_v21 = vpack.c.bf16 %v95_v19, %v87_v18  ;;  %v97_v22 = vld [vmem:[#allocation2 + $0x70] sm:$0xff]  ;;  %v1373_v24 = vld [vmem:[#allocation7] sm:$0xff]  }
  0x64   :  { %1166 = vmatpush3.bf16.msra.mxu0 %v1335_v26  ;;  %v98_v15 = vld [vmem:[#allocation2 + $0x78] sm:$0xff]  ;;  %v105_v23 = vpack.c.bf16 %v97_v22, %v89_v20  ;;  %v1374_v26 = vld [vmem:[#allocation7 + $0x8] sm:$0xff]   ;;  %v1381_v33 = vld [vmem:[#allocation8] sm:$0xff]  }
  0x65   :  { %1188 = vmatpush3.bf16.msra.mxu1 %v1336_v27  ;;  %1167 = vmatprep.subr.bf16.mxu0 %v1337_v28  ;;  %v106_v17 = vpack.c.bf16 %v98_v15, %v90_v14  ;;  %v1375_v27 = vld [vmem:[#allocation7 + $0x10] sm:$0xff]   ;;  %v1376_v28 = vld [vmem:[#allocation7 + $0x18] sm:$0xff]   ;;  %v1382_v34 = vld [vmem:[#allocation8 + $0x8] sm:$0xff]  }
  0x66   :  { %1189 = vmatprep.subr.bf16.mxu1 %v1338_v29  ;;  %v1377_v29 = vld [vmem:[#allocation7 + $0x20] sm:$0xff]   ;;  %v1380_v32 = vld [vmem:[#allocation7 + $0x38] sm:$0xff]   ;;  %v1383_v35 = vld [vmem:[#allocation8 + $0x10] sm:$0xff]  }
  0x67   :  { %v1384_v36 = vld [vmem:[#allocation8 + $0x18] sm:$0xff]   ;;  %v1385_v37 = vld [vmem:[#allocation8 + $0x20] sm:$0xff]   ;;  %v1386_v38 = vld [vmem:[#allocation8 + $0x28] sm:$0xff]  }
  0x68   :  { %1168 = vmatpush3.bf16.msra.mxu0 %v1339_v30  ;;  %v1378_v30 = vld [vmem:[#allocation7 + $0x28] sm:$0xff]   ;;  %v1061_v41 = vld [vmem:[%s1667_s2] ss:$0 sm:$0xff]  ;;  %v1388_v12 = vld [vmem:[#allocation8 + $0x38] sm:$0xff]  }
  0x69   :  { %1190 = vmatpush3.bf16.msra.mxu1 %v1340_v31  ;;  %1197 = vmatprep.subr.bf16.mxu0 %v1341_v44  ;;  %v1379_v31 = vld [vmem:[#allocation7 + $0x30] sm:$0xff]   ;;  %v1126_v13 = vld [vmem:[%s1669_s4] ss:$0 sm:$0xff]  ;;  %s1524_s4 = smov [#allocation10]  }
  0x6a   :  { %1219 = vmatprep.subr.bf16.mxu1 %v1342_v45 }
  0x6b   :  { %659 = vmatmul.mubr.bf16.vlgmr.msra.gmra.mrb[0].mxu0 %v99_v40 }
  0x6c   :  { %700 = vmatmul.mubr.bf16.vlgmr.msra.gmra.mrb[0].mxu1 %v101_v43  ;;  %1198 = vmatpush3.bf16.msra.mxu0 %v1343_v46 }
  0x6d   :  { %1220 = vmatpush3.bf16.msra.mxu1 %v1344_v47  ;;  %1199 = vmatprep.subr.bf16.mxu0 %v1345_v48 }
  0x6e   :  { %1221 = vmatprep.subr.bf16.mxu1 %v1346_v49  ;;  %740 = vmatprep.mubr.bf16.mxu0 %v104_v16 }
  0x6f   :  { %781 = vmatprep.mubr.bf16.mxu1 %v106_v17 }
  0x70   :  { %1200 = vmatpush3.bf16.msra.mxu0 %v1347_v50 }
  0x71   :  { %1222 = vmatpush3.bf16.msra.mxu1 %v1348_v51  ;;  %1201 = vmatprep.subr.bf16.mxu0 %v1349_v52 }
  0x72   :  { %1223 = vmatprep.subr.bf16.mxu1 %v1350_v53 }
  0x74   :  { %1202 = vmatpush3.bf16.msra.mxu0 %v1351_v54 }
  0x75   :  { %1224 = vmatpush3.bf16.msra.mxu1 %v1352_v55  ;;  %1203 = vmatprep.subr.bf16.mxu0 %v1353_v56 }
  0x76   :  { %1225 = vmatprep.subr.bf16.mxu1 %v1354_v57 }
  0x78   :  { %1204 = vmatpush3.bf16.msra.mxu0 %v1355_v58 }
  0x79   :  { %1226 = vmatpush3.bf16.msra.mxu1 %v1356_v59  ;;  %1205 = vmatprep.subr.bf16.mxu0 %v1357_v60 }
  0x7a   :  { %1227 = vmatprep.subr.bf16.mxu1 %v1358_v61 }
  0x7c   :  { %1206 = vmatpush3.bf16.msra.mxu0 %v1359_v62 }
  0x7d   :  { %1228 = vmatpush3.bf16.msra.mxu1 %v1360_v63  ;;  %1207 = vmatprep.subr.bf16.mxu0 %v1361_v0 }
  0x7e   :  { %1229 = vmatprep.subr.bf16.mxu1 %v1362_v1 }
  0x80   :  { %1208 = vmatpush3.bf16.msra.mxu0 %v1363_v2 }
  0x81   :  { %1230 = vmatpush3.bf16.msra.mxu1 %v1364_v3  ;;  %1209 = vmatprep.subr.bf16.mxu0 %v1365_v4 }
  0x82   :  { %1231 = vmatprep.subr.bf16.mxu1 %v1366_v5 }
  0x84   :  { %1210 = vmatpush3.bf16.msra.mxu0 %v1367_v6 }
  0x85   :  { %1232 = vmatpush3.bf16.msra.mxu1 %v1368_v7  ;;  %1211 = vmatprep.subr.bf16.mxu0 %v1369_v8 }
  0x86   :  { %1233 = vmatprep.subr.bf16.mxu1 %v1370_v9 }
  0x88   :  { %1212 = vmatpush3.bf16.msra.mxu0 %v1371_v10 }
  0x89   :  { %1234 = vmatpush3.bf16.msra.mxu1 %v1372_v11  ;;  %1259 = vmatprep.subr.bf16.mxu0 %v1522_v25  ;;  %v1387_v11 = vld [vmem:[#allocation8 + $0x30] sm:$0xff]  }
  0x8a   :  { %1279 = vmatprep.subr.bf16.mxu1 %v1522_v25 }
  0x8b   :  { %741 = vmatmul.mubr.bf16.vlgmr.msra.gmra.mrb[4].mxu0 %v103_v21 }
  0x8c   :  { %782 = vmatmul.mubr.bf16.vlgmr.msra.gmra.mrb[4].mxu1 %v105_v23  ;;  %1260 = vmatpush3.bf16.msra.mxu0 %v1373_v24  ;;  %v1135_v23 = vld [vmem:[%s1671_s6] ss:$0 sm:$0xff]  ;;  %s1047_s6 = sshll.u32 %s1524_s4, 4  ;;  %s1048_s6 = int_to_ptr.vmem [resolvable:$true] %s1047_s6 }
  0x8d   :  { %1261 = vmatprep.subr.bf16.mxu0 %v1522_v25  ;;  %1275 = vmatprep.mubr.msk.bf16.mxu0 %vm1523_vm0, %v1522_v25  ;;  %s1485_s8 = scalar_lea.vmem %s1048_s6, 128  ;;  %p1490_p5 = scmp.lt.s32.totalorder %s1048_s6, %s1048_s6 }
  0x8e   :  { %1295 = vmatprep.mubr.msk.bf16.mxu1 %vm1523_vm0, %v1522_v25  ;;  %1280 = vmatpush3.bf16.msra.mxu1 %v1381_v33  ;;  %p1486_p4 = scmp.ne.s32.totalorder %s1048_s6, %s1485_s8  ;;  %p1491_p6 = scmp.lt.s32.totalorder %s1485_s8, %s1485_s8 }
  0x8f   :  { %1281 = vmatprep.subr.bf16.mxu1 %v1522_v25 }
  0x90   :  { %1262 = vmatpush3.bf16.msra.mxu0 %v1374_v26  ;;  %p1492_p7 = por %p1491_p6, %p1490_p5 }
  0x91   :  { %1263 = vmatprep.subr.bf16.mxu0 %v1522_v25 }
  0x92   :  { %1282 = vmatpush3.bf16.msra.mxu1 %v1382_v34  ;;  %p1493_p8 = pnand %p1492_p7, %p1486_p4 }
  0x93   :  { %1283 = vmatprep.subr.bf16.mxu1 %v1522_v25 }
  0x94   :  { %1264 = vmatpush3.bf16.msra.mxu0 %v1375_v27 }
  0x95   :  { %1265 = vmatprep.subr.bf16.mxu0 %v1522_v25 }
  0x96   :  { %1284 = vmatpush3.bf16.msra.mxu1 %v1383_v35 }
  0x97   :  { %1285 = vmatprep.subr.bf16.mxu1 %v1522_v25 }
  0x98   :  { %1266 = vmatpush3.bf16.msra.mxu0 %v1376_v28 }
  0x99   :  { %1267 = vmatprep.subr.bf16.mxu0 %v1522_v25 }
  0x9a   :  { %1286 = vmatpush3.bf16.msra.mxu1 %v1384_v36 }
  0x9b   :  { %1287 = vmatprep.subr.bf16.mxu1 %v1522_v25 }
  0x9c   :  { %1268 = vmatpush3.bf16.msra.mxu0 %v1377_v29 }
  0x9d   :  { %1269 = vmatprep.subr.bf16.mxu0 %v1522_v25 }
  0x9e   :  { %1288 = vmatpush3.bf16.msra.mxu1 %v1385_v37 }
  0x9f   :  { %1289 = vmatprep.subr.bf16.mxu1 %v1522_v25 }
  0xa0   :  { %1270 = vmatpush3.bf16.msra.mxu0 %v1378_v30 }
  0xa1   :  { %1271 = vmatprep.subr.bf16.mxu0 %v1522_v25 }
  0xa2   :  { %1290 = vmatpush3.bf16.msra.mxu1 %v1386_v38 }
  0xa3   :  { %1291 = vmatprep.subr.bf16.mxu1 %v1522_v25 }
  0xa4   :  { %1272 = vmatpush3.bf16.msra.mxu0 %v1379_v31 }
  0xa5   :  { %1273 = vmatprep.subr.bf16.mxu0 %v1522_v25 }
  0xa6   :  { %1292 = vmatpush3.bf16.msra.mxu1 %v1387_v11 }
  0xa7   :  { %1293 = vmatprep.subr.bf16.mxu1 %v1522_v25 }
  0xa8   :  { %1274 = vmatpush3.bf16.msra.mxu0 %v1380_v32 }
  0xaa   :  { %1294 = vmatpush3.bf16.msra.mxu1 %v1388_v12 }
 0x13e   :  { %v1169_v39 = vpop.f32.mrb[0].mxu0 }
 0x13f   :  { %v1191_v40 = vpop.f32.mrb[0].mxu1  ;;  %v1170_v42 = vpop.f32.mrb[1].mxu0 }
 0x140   :  { %v1171_v43 = vadd.f32 %v1170_v42, %v1169_v39  ;;  %v1192_v44 = vpop.f32.mrb[1].mxu1  ;;  %v1172_v45 = vpop.f32.mrb[2].mxu0 }
 0x141   :  { %v1193_v46 = vadd.f32 %v1192_v44, %v1191_v40  ;;  %v1194_v47 = vpop.f32.mrb[2].mxu1  ;;  %v1173_v48 = vpop.f32.mrb[3].mxu0 }
 0x142   :  { %v661_v49 = vadd.f32 %v1171_v43, %v1061_v41  ;;  %v1174_v50 = vadd.f32 %v1173_v48, %v1172_v45  ;;  %v1195_v51 = vpop.f32.mrb[3].mxu1 }
 0x143   :  { %v1196_v52 = vadd.f32 %v1195_v51, %v1194_v47 }
 0x144   :  { %v702_v53 = vadd.f32 %v1193_v46, %v661_v49  ;;  %v664_v54 = vadd.f32 %v1174_v50, %v1061_v41 }
 0x146   :  { %v705_v55 = vadd.f32 %v1196_v52, %v664_v54 }
 0x15e   :  { %v1213_v56 = vpop.f32.mrb[4].mxu0 }
 0x15f   :  { %v1235_v57 = vpop.f32.mrb[4].mxu1  ;;  %v1214_v58 = vpop.f32.mrb[5].mxu0 }
 0x160   :  { %v1215_v59 = vadd.f32 %v1214_v58, %v1213_v56  ;;  %v1236_v60 = vpop.f32.mrb[5].mxu1  ;;  %v1216_v61 = vpop.f32.mrb[6].mxu0 }
 0x161   :  { %v1237_v62 = vadd.f32 %v1236_v60, %v1235_v57  ;;  %v1238_v63 = vpop.f32.mrb[6].mxu1  ;;  %v1217_v0 = vpop.f32.mrb[7].mxu0 }
 0x162   :  { %v743_v1 = vadd.f32 %v1215_v59, %v702_v53  ;;  %v1218_v2 = vadd.f32 %v1217_v0, %v1216_v61  ;;  %v1239_v3 = vpop.f32.mrb[7].mxu1 }
 0x163   :  { %v1240_v4 = vadd.f32 %v1239_v3, %v1238_v63 }
 0x164   :  { %v784_v5 = vadd.f32 %v1237_v62, %v743_v1  ;;  %v746_v6 = vadd.f32 %v1218_v2, %v705_v55 }
 0x166   :  { %v787_v7 = vadd.f32 %v1240_v4, %v746_v6  ;;  %v790_v8 = vmax.f32 %v784_v5, 0.0 }
 0x168   :  { %v791_v9 = vmax.f32 %v787_v7, 0.0 }
 0x16a   :  { %v792_v10 = vpack.c.bf16 %v791_v9, %v790_v8 }
 0x16c   :  { %1276 = vmatmul.mubr.bf16.vlgmr.msra.gmra.mrb[8].mxu0 %v792_v10 }
 0x23f   :  { %v898_v14 = vpop.f32.mrb[8].mxu0 }
 0x240   :  { %v899_v15 = vadd.f32 %v1126_v13, %v898_v14  ;;  %v1277_v16 = vpop.f32.mrb[9].mxu0 }
 0x241   :  { %v901_v17 = vpop.f32.mrb[10].mxu0 }
 0x242   :  { %v902_v18 = vadd.f32 %v1126_v13, %v901_v17  ;;  %v1278_v19 = vpop.f32.mrb[11].mxu0  ;;  %v905_v20 = vmax.f32 %v899_v15, 0.0 }
 0x244   :  { %v906_v21 = vmax.f32 %v902_v18, 0.0 }
 0x246   :  { %v907_v22 = vpack.c.bf16 %v906_v21, %v905_v20 }
 0x248   :  { %1296 = vmatmul.mubr.bf16.vlgmr.msra.gmra.mrb[8].mxu1 %v907_v22 }
 0x31b   :  { %v1013_v24 = vpop.f32.mrb[8].mxu1 }
 0x31c   :  { %v1014_v25 = vadd.f32 %v1135_v23, %v1013_v24  ;;  %v1297_v26 = vpop.f32.mrb[9].mxu1 }
 0x31d   :  { %v1016_v27 = vpop.f32.mrb[10].mxu1 }
 0x31e   :  { %v1020_v28 = vsub.f32 0.0, %v1014_v25  ;;  %v1017_v29 = vadd.f32 %v1135_v23, %v1016_v27  ;;  %v1298_v30 = vpop.f32.mrb[11].mxu1 }
 0x320   :  { %v1022_v31 = vmul.f32 1.442695, %v1020_v28  ;;  %v1021_v32 = vsub.f32 0.0, %v1017_v29 }
 0x322   :  { %1389 = vpow2.f32 %v1022_v31  ;;  %v1024_v33 = vmul.f32 1.442695, %v1021_v32 }
 0x324   :  { %1391 = vpow2.f32 %v1024_v33 }
 0x32c   :  { %v1390_v34 = vpop.eup %1389 }
 0x32d   :  { %v1026_v35 = vadd.f32 1.0, %v1390_v34 }
 0x32e   :  { %v1392_v36 = vpop.eup %1391 }
 0x32f   :  { %v1027_v37 = vadd.f32 1.0, %v1392_v36  ;;  %1393 = vrcp.f32 %v1026_v35 }
 0x331   :  { %1395 = vrcp.f32 %v1027_v37 }
 0x339   :  { %v1394_v38 = vpop.eup %1393 }
 0x33b   :  { %v1396_v39 = vpop.eup %1395 }
 0x33c   :  { %v1151_v40 = vpack.c.bf16 %v1396_v39, %v1394_v38 }
 0x33e   :  { %1152 = vst [vmem:[#allocation10] sm:$0xff] %v1151_v40  }
 0x33f   :  { %1496 = shalt.err (!%p1493_p8)
}
 0x340   :  { %s1497_s13 = scalar_lea.hbm %s1672_s7, 128 }
 0x341   :  { %p1498_p9 = scmp.ne.s32.totalorder %s1672_s7, %s1497_s13  ;;  %p1501_p10 = scmp.lt.u32.totalorder %s1497_s13, %s1672_s7 }
 0x343   :  { %p1503_p11 = pnand %p1501_p10, %p1498_p9 }
 0x345   :  { %1506 = shalt.err (!%p1503_p11)
}
 0x346   :  { %1053 = dma.vmem_to_hbm [thread:$0]  %s1048_s6, 128, %s1672_s7, [#allocation4], %s1516_s11, %s1516_s11, %s1517_s12  }
 0x347   :  { %1513 = dma.done.wait [#allocation4], 128  }
 0x348   :  { %1514 = vsyncadd [#allocation4], 4294967168 }
 0x349   :  { %1057 = vsyncpa [#allocation3], 1 }
 0x34a   :  { %1058 = vsyncpa [#allocation6], 1 }
 0x34b   :  { %1059 = vsyncpa [#allocation9], 1 }
 0x34c   :  { %1060 = vsyncpa [#allocation4], 1 }

</bundles_post_ra>
